<compile_context>
chip_gen: v7x
topology: tpu7x:2x2x1
jax: 0.10.0
libtpu: 0.0.40
codegen_flags: <defaults>
</compile_context>

<pallas_src>
import functools

import numpy as np
import jax
import jax.numpy as jnp
from jax.experimental import pallas as pl
from jax.experimental.pallas import tpu as pltpu


def _maxmin_group_kernel(labels_ref, act_ref, max_ref, min_ref, cnt_ref, *, class_tile):
    """One grid step handles `class_tile` consecutive classes.

    labels_ref: (1, N)  int32, 1-indexed labels (0 = ignore)
    act_ref:    (Ct, G, N) float32 activations for this class block
    *_ref outs: (1, 8, 128) float32 partial results (scalar broadcast, lane-dense)
    """
    i = pl.program_id(0)

    a = act_ref[...]                                   # (Ct, G, N)
    labels = labels_ref[...]                           # (1, N)

    n = labels.shape[1]
    # 1-indexed class ids covered by this block, one row per class.
    cls_id = jax.lax.broadcasted_iota(jnp.int32, (class_tile, n), 0)
    cls_id = cls_id + (i * class_tile + 1)
    mask = labels == cls_id                            # (Ct, N) sample-membership

    row_max = jnp.max(a, axis=1)                       # (Ct, N) max over groups
    row_min = jnp.min(a, axis=1)                       # (Ct, N) min over groups

    # where-select (not multiply) so padded / out-of-range class rows can never
    # leak garbage into the sums.
    s_max = jnp.sum(jnp.where(mask, row_max, 0.0))
    s_min = jnp.sum(jnp.where(mask, row_min, 0.0))

    maskf = mask.astype(jnp.float32)
    present = jnp.max(maskf, axis=1, keepdims=True)    # (Ct, 1): 1.0 iff class present
    cnt = jnp.sum(present)

    # Lane-dense full-vreg stores of the broadcast scalars.
    max_ref[...] = jnp.zeros_like(max_ref) + s_max
    min_ref[...] = jnp.zeros_like(min_ref) + s_min
    cnt_ref[...] = jnp.zeros_like(cnt_ref) + cnt


def max_min_group_activation(list_group_activation, target_labels, *,
                             class_tile=None,
                             vmem_budget_bytes=32 * 1024 * 1024):
    """JAX/Pallas equivalent of MaxMinGroupActivation.forward.

    list_group_activation: list (length C) of (N, G) arrays, OR a pre-stacked
                           (C, G, N) array (class, group, sample) to avoid the
                           stacking copy.
    target_labels:         N integer labels (any shape, flattened), 1-indexed;
                           0 means "no class" and is skipped.
    Returns (-mean_max / N, mean_min / N) as two scalars.
    """
    if isinstance(list_group_activation, (list, tuple)):
        # Single materialization directly into the kernel-friendly (C, G, N)
        # layout (sample axis last -> lanes).
        A = jnp.stack([jnp.asarray(x).T for x in list_group_activation], axis=0)
    else:
        A = jnp.asarray(list_group_activation)         # already (C, G, N): no copy
    A = A.astype(jnp.float32)
    C, G, N = A.shape

    labels = jnp.asarray(target_labels).reshape(-1).astype(jnp.int32)
    total = labels.shape[0]
    assert total == N, "each class activation tensor must have N rows"
    labels2d = labels.reshape(1, N)

    # --- choose how many classes to process per grid step --------------------
    # Keep one double-buffered activation block well inside the scoped-VMEM
    # budget on all generations (v5e default 16 MiB, v7x physical 64 MiB).
    if class_tile is None:
        per_buffer = max(vmem_budget_bytes // 4, G * N * 4)
        class_tile = max(1, min(C, per_buffer // (G * N * 4)))
    Ct = int(class_tile)
    n_blocks = -(-C // Ct)
    Cp = n_blocks * Ct
    if Cp != C:
        # Padded classes get ids > C which never match any label -> masked out.
        A = jnp.pad(A, ((0, Cp - C), (0, 0), (0, 0)))

    # --- pallas call ----------------------------------------------------------
    out_block = pl.BlockSpec((1, 8, 128), lambda i: (i, 0, 0))
    partial_shape = jax.ShapeDtypeStruct((n_blocks, 8, 128), jnp.float32)

    p_max, p_min, p_cnt = pl.pallas_call(
        functools.partial(_maxmin_group_kernel, class_tile=Ct),
        out_shape=(partial_shape, partial_shape, partial_shape),
        grid_spec=pltpu.PrefetchScalarGridSpec(
            num_scalar_prefetch=0,
            grid=(n_blocks,),
            in_specs=[
                pl.BlockSpec((1, N), lambda i: (0, 0)),        # labels (resident)
                pl.BlockSpec((Ct, G, N), lambda i: (i, 0, 0)),  # class block
            ],
            out_specs=(out_block, out_block, out_block),
        ),
        compiler_params=pltpu.CompilerParams(
            # Each class-block is independent -> parallel (megacore on v7x).
            dimension_semantics=("parallel",),
            vmem_limit_bytes=48 * 1024 * 1024,
        ),
    )(labels2d, A)

    # --- tiny final reduction + scalar glue in plain JAX ----------------------
    sum_max = jnp.sum(p_max[:, 0, 0])
    sum_min = jnp.sum(p_min[:, 0, 0])
    cnt = jnp.sum(p_cnt[:, 0, 0])

    safe_cnt = jnp.maximum(cnt, 1.0)
    mean_max = jnp.where(cnt > 0, sum_max / safe_cnt, 0.0)
    mean_min = jnp.where(cnt > 0, sum_min / safe_cnt, 0.0)
    return (-mean_max / total, mean_min / total)


def _reference(list_group_activation, target_labels):
    """Pure JAX/numpy transliteration of the PyTorch forward (verification)."""
    labels = jnp.asarray(target_labels).reshape(-1) - 1
    maxs, mins = [], []
    for cls_i in np.unique(np.asarray(labels)):
        if cls_i < 0:
            continue
        mask = labels == int(cls_i)
        if int(mask.sum()) == 0:
            continue
        ga = jnp.asarray(list_group_activation[int(cls_i)])[np.asarray(mask)]
        maxs.append(jnp.sum(jnp.max(ga, axis=-1), axis=0))
        mins.append(jnp.sum(jnp.min(ga, axis=-1), axis=0))
    tm = jnp.mean(jnp.stack(maxs))
    tn = jnp.mean(jnp.stack(mins))
    n = labels.shape[0]
    return (-tm / n, tn / n)


if __name__ == "__main__":
    key = jax.random.PRNGKey(0)

    # --- test 1: small case, single class block -------------------------------
    C, N, G = 4, 8, 32
    k_act, k_lab, key = jax.random.split(key, 3)
    act_keys = jax.random.split(k_act, C)
    lga = [jax.random.normal(act_keys[i], (N, G), dtype=jnp.float32) for i in range(C)]
    labels = jax.random.randint(k_lab, (N,), 0, C + 1, dtype=jnp.int32)
    labels = labels.at[0].set(1)  # guarantee at least one valid class

    out = jax.block_until_ready(max_min_group_activation(lga, labels))
    ref = _reference(lga, labels)
    np.testing.assert_allclose(np.asarray(out[0]), np.asarray(ref[0]), rtol=1e-5, atol=1e-5)
    np.testing.assert_allclose(np.asarray(out[1]), np.asarray(ref[1]), rtol=1e-5, atol=1e-5)

    # --- test 2: multi-block grid with class-dim padding (C % class_tile != 0) -
    C2, N2, G2 = 5, 16, 8
    k_act2, k_lab2, key = jax.random.split(key, 3)
    act_keys2 = jax.random.split(k_act2, C2)
    lga2 = [jax.random.normal(act_keys2[i], (N2, G2), dtype=jnp.float32) for i in range(C2)]
    labels2 = jax.random.randint(k_lab2, (N2,), 0, C2 + 1, dtype=jnp.int32)
    labels2 = labels2.at[0].set(3)

    out2 = jax.block_until_ready(
        max_min_group_activation(lga2, labels2, class_tile=2))
    ref2 = _reference(lga2, labels2)
    np.testing.assert_allclose(np.asarray(out2[0]), np.asarray(ref2[0]), rtol=1e-5, atol=1e-5)
    np.testing.assert_allclose(np.asarray(out2[1]), np.asarray(ref2[1]), rtol=1e-5, atol=1e-5)

    print("KERNEL_OK")
</pallas_src>

<mosaic_0001>
module attributes {stable_mosaic.version = 11 : i64} {
  func.func @_maxmin_group_kernel(%arg0: i32, %arg1: memref<1x8xi32, #tpu.memory_space<vmem>>, %arg2: memref<4x32x8xf32, #tpu.memory_space<vmem>>, %arg3: memref<1x8x128xf32, #tpu.memory_space<vmem>>, %arg4: memref<1x8x128xf32, #tpu.memory_space<vmem>>, %arg5: memref<1x8x128xf32, #tpu.memory_space<vmem>>) attributes {dimension_semantics = [#tpu.dimension_semantics<parallel>], iteration_bounds = array<i64: 1>, scalar_prefetch = 0 : i64, scratch_operands = 0 : i64, tpu.core_type = #tpu.core_type<tc>, window_params = [{pipeline_mode = #tpu.pipeline_mode<synchronous>, transform_indices = @transform_0, window_bounds = array<i64: 1, 8>}, {transform_indices = @transform_1, window_bounds = array<i64: 4, 32, 8>}, {transform_indices = @transform_2, window_bounds = array<i64: 1, 8, 128>}, {transform_indices = @transform_3, window_bounds = array<i64: 1, 8, 128>}, {transform_indices = @transform_4, window_bounds = array<i64: 1, 8, 128>}]} {
    %c0 = arith.constant 0 : index
    %c0_0 = arith.constant 0 : index
    %c0_1 = arith.constant 0 : index
    %0 = vector.load %arg2[%c0, %c0_0, %c0_1] : memref<4x32x8xf32, #tpu.memory_space<vmem>>, vector<4x32x8xf32>
    %c0_2 = arith.constant 0 : index
    %c0_3 = arith.constant 0 : index
    %1 = vector.load %arg1[%c0_2, %c0_3] : memref<1x8xi32, #tpu.memory_space<vmem>>, vector<1x8xi32>
    %2 = tpu.iota {dimensions = array<i32: 0>} : vector<4x8xi32>
    %c4_i32 = arith.constant 4 : i32
    %3 = arith.muli %arg0, %c4_i32 : i32
    %c1_i32 = arith.constant 1 : i32
    %4 = arith.addi %3, %c1_i32 : i32
    %5 = vector.broadcast %4 : i32 to vector<4x8xi32>
    %6 = arith.addi %2, %5 : vector<4x8xi32>
    %7 = vector.broadcast %1 : vector<1x8xi32> to vector<4x8xi32>
    %8 = arith.cmpi eq, %7, %6 : vector<4x8xi32>
    %cst = arith.constant dense<0xFF800000> : vector<4x8xf32>
    %9 = vector.multi_reduction <maximumf>, %0, %cst [1] : vector<4x32x8xf32> to vector<4x8xf32>
    %cst_4 = arith.constant dense<0x7F800000> : vector<4x8xf32>
    %10 = vector.multi_reduction <minimumf>, %0, %cst_4 [1] : vector<4x32x8xf32> to vector<4x8xf32>
    %cst_5 = arith.constant 0.000000e+00 : f32
    %11 = vector.broadcast %cst_5 : f32 to vector<4x8xf32>
    %12 = arith.select %8, %9, %11 : vector<4x8xi1>, vector<4x8xf32>
    %13 = vector.shape_cast %12 : vector<4x8xf32> to vector<1x4x8xf32>
    %cst_6 = arith.constant dense<0.000000e+00> : vector<1xf32>
    %14 = vector.multi_reduction <add>, %13, %cst_6 [1, 2] : vector<1x4x8xf32> to vector<1xf32>
    %15 = vector.shape_cast %14 : vector<1xf32> to vector<1x1x1xf32>
    %16 = vector.extract %15[0, 0, 0] : f32 from vector<1x1x1xf32>
    %cst_7 = arith.constant 0.000000e+00 : f32
    %17 = vector.broadcast %cst_7 : f32 to vector<4x8xf32>
    %18 = arith.select %8, %10, %17 : vector<4x8xi1>, vector<4x8xf32>
    %19 = vector.shape_cast %18 : vector<4x8xf32> to vector<1x4x8xf32>
    %cst_8 = arith.constant dense<0.000000e+00> : vector<1xf32>
    %20 = vector.multi_reduction <add>, %19, %cst_8 [1, 2] : vector<1x4x8xf32> to vector<1xf32>
    %21 = vector.shape_cast %20 : vector<1xf32> to vector<1x1x1xf32>
    %22 = vector.extract %21[0, 0, 0] : f32 from vector<1x1x1xf32>
    %23 = arith.extui %8 : vector<4x8xi1> to vector<4x8xi32>
    %24 = arith.sitofp %23 : vector<4x8xi32> to vector<4x8xf32>
    %cst_9 = arith.constant dense<0xFF800000> : vector<4xf32>
    %25 = vector.multi_reduction <maximumf>, %24, %cst_9 [1] : vector<4x8xf32> to vector<4xf32>
    %26 = vector.shape_cast %25 : vector<4xf32> to vector<4x1xf32>
    %27 = vector.shape_cast %26 : vector<4x1xf32> to vector<1x4x1xf32>
    %cst_10 = arith.constant dense<0.000000e+00> : vector<1xf32>
    %28 = vector.multi_reduction <add>, %27, %cst_10 [1, 2] : vector<1x4x1xf32> to vector<1xf32>
    %29 = vector.shape_cast %28 : vector<1xf32> to vector<1x1x1xf32>
    %30 = vector.extract %29[0, 0, 0] : f32 from vector<1x1x1xf32>
    %cst_11 = arith.constant 0.000000e+00 : f32
    %31 = vector.broadcast %cst_11 : f32 to vector<1x8x128xf32>
    %32 = vector.broadcast %16 : f32 to vector<1x8x128xf32>
    %33 = arith.addf %31, %32 : vector<1x8x128xf32>
    %c0_12 = arith.constant 0 : index
    %c0_13 = arith.constant 0 : index
    %c0_14 = arith.constant 0 : index
    %34 = vector.load %arg3[%c0_12, %c0_13, %c0_14] : memref<1x8x128xf32, #tpu.memory_space<vmem>>, vector<1x8x128xf32>
    tpu.vector_store %arg3[%c0_12, %c0_13, %c0_14], %33 {strides = array<i32>} : memref<1x8x128xf32, #tpu.memory_space<vmem>>, vector<1x8x128xf32>,
    %cst_15 = arith.constant 0.000000e+00 : f32
    %35 = vector.broadcast %cst_15 : f32 to vector<1x8x128xf32>
    %36 = vector.broadcast %22 : f32 to vector<1x8x128xf32>
    %37 = arith.addf %35, %36 : vector<1x8x128xf32>
    %c0_16 = arith.constant 0 : index
    %c0_17 = arith.constant 0 : index
    %c0_18 = arith.constant 0 : index
    %38 = vector.load %arg4[%c0_16, %c0_17, %c0_18] : memref<1x8x128xf32, #tpu.memory_space<vmem>>, vector<1x8x128xf32>
    tpu.vector_store %arg4[%c0_16, %c0_17, %c0_18], %37 {strides = array<i32>} : memref<1x8x128xf32, #tpu.memory_space<vmem>>, vector<1x8x128xf32>,
    %cst_19 = arith.constant 0.000000e+00 : f32
    %39 = vector.broadcast %cst_19 : f32 to vector<1x8x128xf32>
    %40 = vector.broadcast %30 : f32 to vector<1x8x128xf32>
    %41 = arith.addf %39, %40 : vector<1x8x128xf32>
    %c0_20 = arith.constant 0 : index
    %c0_21 = arith.constant 0 : index
    %c0_22 = arith.constant 0 : index
    %42 = vector.load %arg5[%c0_20, %c0_21, %c0_22] : memref<1x8x128xf32, #tpu.memory_space<vmem>>, vector<1x8x128xf32>
    tpu.vector_store %arg5[%c0_20, %c0_21, %c0_22], %41 {strides = array<i32>} : memref<1x8x128xf32, #tpu.memory_space<vmem>>, vector<1x8x128xf32>,
    return
  }
  func.func @transform_0(%arg0: i32) -> (i32, i32) {
    %c0_i32 = arith.constant 0 : i32
    %c0_i32_0 = arith.constant 0 : i32
    %c0_i32_1 = arith.constant 0 : i32
    return %c0_i32, %c0_i32_0 : i32, i32
  }
  func.func @transform_1(%arg0: i32) -> (i32, i32, i32) {
    %c0_i32 = arith.constant 0 : i32
    %c0_i32_0 = arith.constant 0 : i32
    %c0_i32_1 = arith.constant 0 : i32
    return %arg0, %c0_i32, %c0_i32_0 : i32, i32, i32
  }
  func.func @transform_2(%arg0: i32) -> (i32, i32, i32) {
    %c0_i32 = arith.constant 0 : i32
    %c0_i32_0 = arith.constant 0 : i32
    %c0_i32_1 = arith.constant 0 : i32
    return %arg0, %c0_i32, %c0_i32_0 : i32, i32, i32
  }
  func.func @transform_3(%arg0: i32) -> (i32, i32, i32) {
    %c0_i32 = arith.constant 0 : i32
    %c0_i32_0 = arith.constant 0 : i32
    %c0_i32_1 = arith.constant 0 : i32
    return %arg0, %c0_i32, %c0_i32_0 : i32, i32, i32
  }
  func.func @transform_4(%arg0: i32) -> (i32, i32, i32) {
    %c0_i32 = arith.constant 0 : i32
    %c0_i32_0 = arith.constant 0 : i32
    %c0_i32_1 = arith.constant 0 : i32
    return %arg0, %c0_i32, %c0_i32_0 : i32, i32, i32
  }
}

</mosaic_0001>

<bundles_post_ra>
// kernel: tpu_custom_call.1
= control target key start
LH: loop header
LB: loop body
LE: loop exit
PB: predicated region body
PF: predicated region fallthrough
CT: control target
= control target key end

     0   :  { %10 = vsyncpa [#allocation3], 0  ;;  %v33_v0 = vlaneseq  ;;  %vm161_vm0 = vcmask 60416   ;;  %vm44_vm1 = vcmask 64512   ;;  %s550_s0 = inlined_call_operand.vmem [shape: s32[1,8], index: 0, kind: input, shape index: {}]   ;;  %s551_s1 = inlined_call_operand.vmem [shape: f32[4,32,8], index: 1, kind: input, shape index: {}]   ;;  %s552_s2 = inlined_call_operand.hbm [shape: f32[1,8,128], index: 2, kind: output, shape index: {0}]   ;;  %s553_s3 = inlined_call_operand.hbm [shape: f32[1,8,128], index: 3, kind: output, shape index: {1}]   ;;  %s554_s4 = inlined_call_operand.hbm [shape: f32[1,8,128], index: 4, kind: output, shape index: {2}]  }
   0x1   :  { %v16_v1 = vld [vmem:[%s551_s1] sm:$0xff]  ;;  %v17_v2 = vld [vmem:[%s551_s1 + $0x8] sm:$0xff]  ;;  %v18_v4 = vld [vmem:[%s551_s1 + $0x10] sm:$0xff] }
   0x2   :  { %v377_v3 = vld [vmem:[%s550_s0] ss:$0 sm:$0xff]  ;;  %v19_v5 = vld [vmem:[%s551_s1 + $0x18] sm:$0xff]  ;;  %v34_v7 = vshrl.u32 %v33_v0, 7  ;;  %v21_v8 = vld [vmem:[%s551_s1 + $0x28] sm:$0xff]  ;;  %v97_v11 = vsel %vm44_vm1, %v16_v1, inf }
   0x3   :  { %v20_v6 = vld [vmem:[%s551_s1 + $0x20] sm:$0xff]  ;;  %v22_v9 = vld [vmem:[%s551_s1 + $0x30] sm:$0xff]  ;;  %v23_v10 = vld [vmem:[%s551_s1 + $0x38] sm:$0xff]  ;;  %v98_v12 = vsel %vm44_vm1, %v17_v2, inf  ;;  %v100_v17 = vsel %vm44_vm1, %v18_v4, inf  ;;  %v102_v22 = vsel %vm44_vm1, %v19_v5, inf }
   0x4   :  { %v402_v13 = vld [vmem:[%s551_s1 + $0x40] sm:$0xff]  ;;  %v407_v14 = vld [vmem:[%s551_s1 + $0x48] sm:$0xff]  ;;  %v412_v15 = vld [vmem:[%s551_s1 + $0x50] sm:$0xff]  ;;  %v99_v16 = vmin.f32 %v97_v11, %v98_v12  ;;  %v110_v18 = vsel %vm44_vm1, %v20_v6, inf  ;;  %v416_v19 = vadd.s32 1, %v34_v7  ;;  %v111_v23 = vsel %vm44_vm1, %v21_v8, inf }
   0x5   :  { %v421_v20 = vld [vmem:[%s551_s1 + $0x58] sm:$0xff]  ;;  %v426_v21 = vld [vmem:[%s551_s1 + $0x60] sm:$0xff]  ;;  %v113_v24 = vsel %vm44_vm1, %v22_v9, inf  ;;  %v434_v25 = vld [vmem:[%s551_s1 + $0x68] sm:$0xff]  ;;  %v112_v28 = vmin.f32 %v110_v18, %v111_v23  ;;  %v115_v29 = vsel %vm44_vm1, %v23_v10, inf  ;;  %v123_v30 = vsel %vm44_vm1, %v402_v13, inf }
   0x6   :  { %v439_v26 = vld [vmem:[%s551_s1 + $0x70] sm:$0xff]  ;;  %v101_v27 = vmin.f32 %v99_v16, %v100_v17 }
   0x7   :  { %11 = vsyncpa [#allocation5], 0  ;;  %vm43_vm2 = vcmp.eq.s32.totalorder %v377_v3, %v416_v19  ;;  %v124_v31 = vsel %vm44_vm1, %v407_v14, inf  ;;  %v126_v32 = vsel %vm44_vm1, %v412_v15, inf  ;;  %v128_v33 = vsel %vm44_vm1, %v421_v20, inf  ;;  %v458_v36 = vld [vmem:[%s551_s1 + $0x78] sm:$0xff] }
   0x8   :  { %v339_v34 = vmov 0.0   ;;  %v103_v37 = vmin.f32 %v101_v27, %v102_v22  ;;  %v114_v38 = vmin.f32 %v112_v28, %v113_v24  ;;  %v125_v39 = vmin.f32 %v123_v30, %v124_v31  ;;  %s340_s1 = smov [#allocation2]   ;;  %s341_s23 = smov [#allocation4]  }
   0x9   :  { %v258_v35 = vsel %vm43_vm2, 1.0, %v339_v34  ;;  %v136_v41 = vsel %vm44_vm1, %v426_v21, inf  ;;  %v137_v42 = vsel %vm44_vm1, %v434_v25, inf  ;;  %v139_v43 = vsel %vm44_vm1, %v439_v26, inf  ;;  %s222_s22 = sshll.u32 %s340_s1, 4  ;;  %s232_s24 = sshll.u32 %s341_s23, 4  ;;  %s223_s22 = int_to_ptr.vmem [resolvable:$true] %s222_s22  ;;  %s507_s24 = int_to_ptr.vmem [resolvable:$true] %s232_s24 }
   0xa   :  { %v193_v40 = vsel %vm161_vm0, %v258_v35, -inf  ;;  %v104_v44 = vrot.slane %v103_v37, 4  ;;  %v116_v45 = vmin.f32 %v114_v38, %v115_v29  ;;  %v127_v46 = vmin.f32 %v125_v39, %v126_v32  ;;  %s269_s27 = scalar_lea.vmem %s223_s22, 128  ;;  %p274_p1 = scmp.lt.s32.totalorder %s223_s22, %s223_s22 }
   0xb   :  { %194 = vmax.xlane.f32.xlu0 %v193_v40  ;;  %v138_v47 = vmin.f32 %v136_v41, %v137_v42  ;;  %v141_v48 = vsel %vm44_vm1, %v458_v36, inf  ;;  %v45_v49 = vsel %vm44_vm1, %v16_v1, -inf  ;;  %v46_v50 = vsel %vm44_vm1, %v17_v2, -inf  ;;  %p270_p0 = scmp.ne.s32.totalorder %s223_s22, %s269_s27  ;;  %p275_p2 = scmp.lt.s32.totalorder %s269_s27, %s269_s27 }
   0xc   :  { %v105_v51 = vmin.f32 %v103_v37, %v104_v44  ;;  %v117_v52 = vrot.slane %v116_v45, 4  ;;  %v129_v53 = vmin.f32 %v127_v46, %v128_v33  ;;  %vm153_vm3 = vcmask 1041409  }
   0xd   :  { %v140_v54 = vmin.f32 %v138_v47, %v139_v43  ;;  %v47_v55 = vmax.f32 %v45_v49, %v46_v50  ;;  %v48_v56 = vsel %vm44_vm1, %v18_v4, -inf  ;;  %v50_v57 = vsel %vm44_vm1, %v19_v5, -inf  ;;  %p276_p3 = por %p275_p2, %p274_p1 }
   0xe   :  { %v58_v58 = vsel %vm44_vm1, %v20_v6, -inf  ;;  %v106_v59 = vrot.slane %v105_v51, 2  ;;  %v118_v60 = vmin.f32 %v116_v45, %v117_v52  ;;  %v130_v61 = vrot.slane %v129_v53, 4 }
   0xf   :  { %v142_v62 = vmin.f32 %v140_v54, %v141_v48  ;;  %vm155_vm4 = vcmask 1042434   ;;  %v49_v63 = vmax.f32 %v47_v55, %v48_v56  ;;  %v59_v0 = vsel %vm44_vm1, %v21_v8, -inf  ;;  %p277_p4 = pnand %p276_p3, %p270_p0 }
  0x10   :  { %v61_v1 = vsel %vm44_vm1, %v22_v9, -inf  ;;  %v63_v2 = vsel %vm44_vm1, %v23_v10, -inf  ;;  %v107_v7 = vmin.f32 %v105_v51, %v106_v59  ;;  %v119_v11 = vrot.slane %v118_v60, 2 }
  0x11   :  { %v131_v12 = vmin.f32 %v129_v53, %v130_v61  ;;  %v143_v4 = vrot.slane %v142_v62, 4  ;;  %vm157_vm5 = vcmask 1043459   ;;  %v51_v5 = vmax.f32 %v49_v63, %v50_v57 }
  0x12   :  { %v60_v16 = vmax.f32 %v58_v58, %v59_v0  ;;  %v71_v6 = vsel %vm44_vm1, %v402_v13, -inf  ;;  %v72_v17 = vsel %vm44_vm1, %v407_v14, -inf  ;;  %v108_v18 = vrot.slane %v107_v7, 1 }
  0x13   :  { %v120_v22 = vmin.f32 %v118_v60, %v119_v11  ;;  %v132_v8 = vrot.slane %v131_v12, 2  ;;  %v144_v23 = vmin.f32 %v142_v62, %v143_v4  ;;  %v52_v9 = vrot.slane %v51_v5, 4 }
  0x14   :  { %v62_v24 = vmax.f32 %v60_v16, %v61_v1  ;;  %v73_v10 = vmax.f32 %v71_v6, %v72_v17  ;;  %v74_v27 = vsel %vm44_vm1, %v412_v15, -inf  ;;  %v109_v28 = vmin.f32 %v107_v7, %v108_v18 }
  0x15   :  { %v121_v29 = vrot.slane %v120_v22, 1  ;;  %v133_v30 = vmin.f32 %v131_v12, %v132_v8  ;;  %v145_v31 = vrot.slane %v144_v23, 2  ;;  %v53_v32 = vmax.f32 %v51_v5, %v52_v9 }
  0x16   :  { %v64_v33 = vmax.f32 %v62_v24, %v63_v2  ;;  %v75_v13 = vmax.f32 %v73_v10, %v74_v27  ;;  %v76_v14 = vsel %vm44_vm1, %v421_v20, -inf  ;;  %v84_v38 = vsel %vm44_vm1, %v426_v21, -inf }
  0x17   :  { %v122_v34 = vmin.f32 %v120_v22, %v121_v29  ;;  %v134_v35 = vrot.slane %v133_v30, 1  ;;  %v146_v37 = vmin.f32 %v144_v23, %v145_v31  ;;  %v54_v39 = vrot.slane %v53_v32, 2 }
  0x18   :  { %v65_v40 = vrot.slane %v64_v33, 4  ;;  %v77_v41 = vmax.f32 %v75_v13, %v76_v14  ;;  %v85_v15 = vsel %vm44_vm1, %v434_v25, -inf  ;;  %v87_v48 = vsel %vm44_vm1, %v439_v26, -inf }
  0x19   :  { %v135_v42 = vmin.f32 %v133_v30, %v134_v35  ;;  %v147_v43 = vrot.slane %v146_v37, 1  ;;  %v176_v44 = vsel %vm153_vm3, %v122_v34, %v109_v28  ;;  %v86_v45 = vmax.f32 %v84_v38, %v85_v15 }
  0x1a   :  { %v55_v46 = vmax.f32 %v53_v32, %v54_v39  ;;  %v66_v47 = vmax.f32 %v64_v33, %v65_v40  ;;  %v78_v20 = vrot.slane %v77_v41, 4  ;;  %v89_v51 = vsel %vm44_vm1, %v458_v36, -inf }
  0x1b   :  { %v148_v49 = vmin.f32 %v146_v37, %v147_v43  ;;  %v177_v21 = vsel %vm155_vm4, %v135_v42, %v176_v44  ;;  %v88_v50 = vmax.f32 %v86_v45, %v87_v48  ;;  %vm196_vm6 = vcmask 3072  }
  0x1c   :  { %v67_v52 = vrot.slane %v66_v47, 2  ;;  %v79_v25 = vmax.f32 %v77_v41, %v78_v20  ;;  %v56_v54 = vrot.slane %v55_v46, 1 }
  0x1d   :  { %v178_v53 = vsel %vm157_vm5, %v148_v49, %v177_v21  ;;  %v90_v55 = vmax.f32 %v88_v50, %v89_v51 }
  0x1e   :  { %v180_v56 = vsel %vm43_vm2, %v178_v53, 0.0  ;;  %v68_v57 = vmax.f32 %v66_v47, %v67_v52  ;;  %v80_v58 = vrot.slane %v79_v25, 2  ;;  %v57_v62 = vmax.f32 %v55_v46, %v56_v54 }
  0x1f   :  { %v181_v26 = vsel %vm161_vm0, %v180_v56, 0.0  ;;  %v91_v59 = vrot.slane %v90_v55, 4 }
  0x20   :  { %182 = vadd.xlane.f32.xlu1 %v181_v26  ;;  %v69_v60 = vrot.slane %v68_v57, 1  ;;  %v81_v61 = vmax.f32 %v79_v25, %v80_v58 }
  0x21   :  { %v92_v36 = vmax.f32 %v90_v55, %v91_v59 }
  0x22   :  { %v70_v63 = vmax.f32 %v68_v57, %v69_v60  ;;  %v82_v0 = vrot.slane %v81_v61, 1 }
  0x23   :  { %v93_v1 = vrot.slane %v92_v36, 2 }
  0x24   :  { %v83_v2 = vmax.f32 %v81_v61, %v82_v0  ;;  %v154_v11 = vsel %vm153_vm3, %v70_v63, %v57_v62 }
  0x25   :  { %v94_v7 = vmax.f32 %v92_v36, %v93_v1 }
  0x26   :  { %v156_v4 = vsel %vm155_vm4, %v83_v2, %v154_v11 }
  0x27   :  { %v95_v12 = vrot.slane %v94_v7, 1 }
  0x29   :  { %v96_v5 = vmax.f32 %v94_v7, %v95_v12 }
  0x2b   :  { %v158_v16 = vsel %vm157_vm5, %v96_v5, %v156_v4 }
  0x2c   :  { %v160_v6 = vsel %vm43_vm2, %v158_v16, 0.0 }
  0x2d   :  { %v162_v17 = vsel %vm161_vm0, %v160_v6, 0.0 }
  0x2e   :  { %163 = vadd.xlane.f32.xlu0 %v162_v17 }
  0x98   :  { %v195_v18 = vpop.xlane.xlu0 %194 }
  0x99   :  { %v197_v22 = vsel %vm196_vm6, %v195_v18, 0.0 }
  0x9a   :  { %198 = vadd.xlane.f32.xlu1 %v197_v22 }
  0xad   :  { %v183_v8 = vpop.xlane.xlu1 %182 }
  0xae   :  { %v184_v23 = vrot.slane %v183_v8, 4 }
  0xb0   :  { %v185_v9 = vadd.f32 %v184_v23, %v183_v8 }
  0xb2   :  { %v186_v24 = vrot.slane %v185_v9, 2 }
  0xb4   :  { %v187_v28 = vadd.f32 %v186_v24, %v185_v9 }
  0xb6   :  { %v188_v31 = vrot.slane %v187_v28, 1 }
  0xb8   :  { %v189_v19 = vadd.f32 %v188_v31, %v187_v28 }
  0xbb   :  { %v164_v10 = vpop.xlane.xlu0 %163 }
  0xbc   :  { %v165_v27 = vrot.slane %v164_v10, 4 }
  0xbe   :  { %v166_v29 = vadd.f32 %v165_v27, %v164_v10 }
  0xc0   :  { %v167_v30 = vrot.slane %v166_v29, 2 }
  0xc2   :  { %v168_v32 = vadd.f32 %v167_v30, %v166_v29 }
  0xc4   :  { %v169_v3 = vrot.slane %v168_v32, 1 }
  0xc6   :  { %v170_v33 = vadd.f32 %v169_v3, %v168_v32 }
  0xc8   :  { %259 = vpush %v170_v33 }
  0xc9   :  { %261 = vpush %v189_v19 }
  0xf9   :  { %s260_s25 = spop %259 }
  0xfa   :  { %v207_v13 = vstv %s260_s25  ;;  %s262_s26 = spop %261 }
  0xfb   :  { %209 = vst [vmem:[#allocation2] sm:$0xff] %v207_v13  ;;  %v210_v14 = vstv %s262_s26 }
  0xfc   :  { %212 = vst [vmem:[#allocation4] sm:$0xff] %v210_v14 }
  0xfd   :  { %280 = shalt.err (!%p277_p4)
}
  0xfe   :  { %s281_s29 = scalar_lea.hbm %s552_s2, 128 }
  0xff   :  { %p282_p5 = scmp.ne.s32.totalorder %s552_s2, %s281_s29  ;;  %p285_p6 = scmp.lt.u32.totalorder %s281_s29, %s552_s2 }
 0x101   :  { %p287_p7 = pnand %p285_p6, %p282_p5 }
 0x103   :  { %290 = shalt.err (!%p287_p7)
}
 0x104   :  { %225 = dma.vmem_to_hbm [thread:$0]  %s223_s22, 128, %s552_s2, [#allocation3]  }
 0x105   :  { %s291_s10 = scalar_lea.vmem %s507_s24, 128  ;;  %p296_p9 = scmp.lt.s32.totalorder %s507_s24, %s507_s24 }
 0x106   :  { %p292_p8 = scmp.ne.s32.totalorder %s507_s24, %s291_s10  ;;  %p297_p10 = scmp.lt.s32.totalorder %s291_s10, %s291_s10 }
 0x108   :  { %p298_p11 = por %p297_p10, %p296_p9 }
 0x10a   :  { %p299_p12 = pnand %p298_p11, %p292_p8 }
 0x10c   :  { %302 = shalt.err (!%p299_p12)
}
 0x10d   :  { %s303_s13 = scalar_lea.hbm %s553_s3, 128 }
 0x10e   :  { %p304_p13 = scmp.ne.s32.totalorder %s553_s3, %s303_s13  ;;  %p307_p0 = scmp.lt.u32.totalorder %s303_s13, %s553_s3 }
 0x110   :  { %p309_p1 = pnand %p307_p0, %p304_p13 }
 0x112   :  { %312 = shalt.err (!%p309_p1)
}
 0x113   :  { %235 = dma.vmem_to_hbm [thread:$0]  %s507_s24, 128, %s553_s3, [#allocation5]  }
 0x114   :  { %s342_s19 = smov [#allocation6]  }
 0x115   :  { %s242_s20 = sshll.u32 %s342_s19, 4  ;;  %s243_s20 = int_to_ptr.vmem [resolvable:$true] %s242_s20 }
 0x116   :  { %s313_s1 = scalar_lea.vmem %s243_s20, 128  ;;  %p318_p3 = scmp.lt.s32.totalorder %s243_s20, %s243_s20 }
 0x117   :  { %p314_p2 = scmp.ne.s32.totalorder %s243_s20, %s313_s1  ;;  %p319_p4 = scmp.lt.s32.totalorder %s313_s1, %s313_s1 }
 0x119   :  { %p320_p5 = por %p319_p4, %p318_p3 }
 0x11b   :  { %p321_p6 = pnand %p320_p5, %p314_p2 }
 0x127   :  { %v199_v34 = vpop.xlane.xlu1 %198 }
 0x128   :  { %v200_v35 = vrot.slane %v199_v34, 4 }
 0x12a   :  { %v201_v37 = vadd.f32 %v200_v35, %v199_v34 }
 0x12c   :  { %v202_v38 = vrot.slane %v201_v37, 2 }
 0x12e   :  { %v203_v39 = vadd.f32 %v202_v38, %v201_v37 }
 0x130   :  { %v204_v40 = vrot.slane %v203_v39, 1 }
 0x132   :  { %v205_v41 = vadd.f32 %v204_v40, %v203_v39 }
 0x134   :  { %263 = vpush %v205_v41 }
 0x165   :  { %s264_s21 = spop %263 }
 0x166   :  { %v213_v15 = vstv %s264_s21 }
 0x167   :  { %215 = vst [vmem:[#allocation6] sm:$0xff] %v213_v15 }
 0x168   :  { %324 = shalt.err (!%p321_p6)
}
 0x169   :  { %s325_s23 = scalar_lea.hbm %s554_s4, 128 }
 0x16a   :  { %p326_p7 = scmp.ne.s32.totalorder %s554_s4, %s325_s23  ;;  %p329_p8 = scmp.lt.u32.totalorder %s325_s23, %s554_s4 }
 0x16c   :  { %p331_p9 = pnand %p329_p8, %p326_p7 }
 0x16e   :  { %334 = shalt.err (!%p331_p9)
}
 0x16f   :  { %245 = dma.vmem_to_hbm [thread:$0]  %s243_s20, 128, %s554_s4, [#allocation5]  }
 0x170   :  { %335 = dma.done.wait [#allocation3], 128  }
 0x171   :  { %336 = vsyncadd [#allocation3], 4294967168 }
 0x172   :  { %337 = dma.done.wait [#allocation5], 256  }
 0x173   :  { %338 = vsyncadd [#allocation5], 4294967040 }
 0x174   :  { %255 = vsyncpa [#allocation3], 1 }
 0x175   :  { %256 = vsyncpa [#allocation5], 1 }

</bundles_post_ra>
